<compile_context>
chip_gen: v6e
topology: v6e:2x2x1
jax: 0.10.0
libtpu: 0.0.40
codegen_flags: <defaults>
</compile_context>

<pallas_src>
import functools

import jax
import jax.numpy as jnp
from jax import lax
from jax.experimental import pallas as pl
from jax.experimental.pallas import tpu as pltpu


def _layer_norm(x, gamma, beta, eps=1e-6):
    # PyTorch nn.LayerNorm: biased variance over the last axis. rsqrt -> EUP.
    mu = jnp.mean(x, axis=-1, keepdims=True)
    var = jnp.mean(jnp.square(x - mu), axis=-1, keepdims=True)
    return (x - mu) * lax.rsqrt(var + eps) * gamma + beta


def encoder_layer_kernel(
    x_ref,                       # (1, S, D)   full sequence; q-tile sliced in-kernel
    wq_ref, wk_ref, wv_ref,      # (D, H*dk), (D, H*dk), (D, H*dv)   fused layouts
    wfc_ref,                     # (H*dv, D)
    ln1_g_ref, ln1_b_ref,        # (1, D)
    w1_ref, b1_ref,              # (D, d_inner), (1, d_inner)
    w2_ref, b2_ref,              # (d_inner, D), (1, D)
    ln2_g_ref, ln2_b_ref,        # (1, D)
    out_ref,                     # (1, TQ, D)
    attn_ref,                    # (1, H, TQ, S)
    k_scr, v_scr,                # (S, H*dk), (S, H*dv)  persistent lane-dense VMEM scratch
    *, n_head, d_k, d_v, tile_q, compute_dtype,
):
    cdt = compute_dtype
    f32 = jnp.float32
    inv_temp = 1.0 / (d_k ** 0.5)   # constant multiply instead of divide

    # ---- K/V projections for the whole sequence: once per batch element,
    # ---- fused over heads (lane-dense N = H*d_k / H*d_v) ---------------------
    @pl.when(pl.program_id(1) == 0)
    def _():
        x_kv = x_ref[0].astype(cdt)                                     # (S, D)
        k_scr[...] = jnp.dot(x_kv, wk_ref[...],
                             preferred_element_type=f32).astype(cdt)    # (S, H*dk)
        v_scr[...] = jnp.dot(x_kv, wv_ref[...],
                             preferred_element_type=f32).astype(cdt)    # (S, H*dv)

    # ---- q-tile (and residual) sliced from the resident x block --------------
    q_start = pl.multiple_of(pl.program_id(1) * tile_q, tile_q)
    x_res = x_ref[0, pl.ds(q_start, tile_q), :].astype(f32)             # (TQ, D)
    x_q = x_res.astype(cdt)

    # Fused Q projection (TQ, H*dk); scale folded into Q.
    q_all = jnp.dot(x_q, wq_ref[...], preferred_element_type=f32) * inv_temp

    k_all = k_scr[...]                                                   # (S, H*dk)
    v_all = v_scr[...]                                                   # (S, H*dv)

    # ---- per-head attention: only QK^T / softmax / P@V stay per-head ---------
    ctx = []
    for h in range(n_head):
        q_h = q_all[:, h * d_k:(h + 1) * d_k].astype(cdt)                # (TQ, dk)
        k_h = k_all[:, h * d_k:(h + 1) * d_k]                            # (S, dk)
        # contract over d_k (minor axis of both operands, no transpose)
        s_h = lax.dot_general(q_h, k_h, (((1,), (1,)), ((), ())),
                              preferred_element_type=f32)                # (TQ, S)
        # stable softmax; exact reciprocal (attn is an exposed output)
        s_h = s_h - jnp.max(s_h, axis=-1, keepdims=True)
        p_h = jnp.exp(s_h)
        p_h = p_h * pl.reciprocal(jnp.sum(p_h, axis=-1, keepdims=True))
        attn_ref[0, h] = p_h.astype(attn_ref.dtype)
        v_h = v_all[:, h * d_v:(h + 1) * d_v]                            # (S, dv)
        ctx.append(jnp.dot(p_h.astype(cdt), v_h,
                           preferred_element_type=f32))                  # (TQ, dv)

    # Fused output projection over all heads at once.
    ctx_cat = jnp.concatenate(ctx, axis=-1).astype(cdt)                  # (TQ, H*dv)
    proj = jnp.dot(ctx_cat, wfc_ref[...], preferred_element_type=f32)    # (TQ, D)

    h1 = _layer_norm(proj + x_res, ln1_g_ref[0], ln1_b_ref[0])

    # ---- position-wise feed forward ------------------------------------------
    ff = jnp.dot(h1.astype(cdt), w1_ref[...],
                 preferred_element_type=f32) + b1_ref[0]
    ff = jnp.maximum(ff, 0.0)
    ff = jnp.dot(ff.astype(cdt), w2_ref[...],
                 preferred_element_type=f32) + b2_ref[0]
    out = _layer_norm(ff + h1, ln2_g_ref[0], ln2_b_ref[0])
    out_ref[0] = out.astype(out_ref.dtype)


def _pick_tile_q(S, block_q, sublane):
    """Largest multiple of `sublane` that divides S and is <= block_q; else S."""
    if S <= block_q:
        return S
    t = (min(block_q, S) // sublane) * sublane
    while t >= sublane:
        if S % t == 0:
            return t
        t -= sublane
    return S


def _default_vmem_limit():
    # 85% of physical VMEM: ~54 MiB on v7x (64 MiB/TC), ~109 MiB on v5e/v6e (128 MiB).
    try:
        cap = pltpu.get_tpu_info().vmem_capacity_bytes
    except Exception:
        cap = 64 * 1024 * 1024
    return int(cap * 0.85)


def encoder_layer(x, params, *, n_head, d_k, d_v,
                  block_q=256,
                  compute_dtype=jnp.bfloat16,
                  attn_dtype=jnp.bfloat16,
                  out_dtype=jnp.float32,
                  vmem_limit_bytes=None):
    """x: (B, S, D) float32. Returns (encoder_output (B,S,D), attn (B,H,S,S))."""
    B, S, D = x.shape
    cdt = compute_dtype

    # Fused (lane-dense) weight layouts: exactly the x @ W layouts the module uses.
    weights = [
        params['wq'].astype(cdt), params['wk'].astype(cdt), params['wv'].astype(cdt),
        params['wfc'].astype(cdt),
        params['ln1_g'], params['ln1_b'],
        params['w1'].astype(cdt), params['b1'],
        params['w2'].astype(cdt), params['b2'],
        params['ln2_g'], params['ln2_b'],
    ]

    # Enforce the tile promise: sublane pack of the narrowest tiled dtype.
    itemsizes = [jnp.dtype(attn_dtype).itemsize, jnp.dtype(out_dtype).itemsize,
                 jnp.dtype(cdt).itemsize]
    sublane = 16 if min(itemsizes) < 4 else 8
    tile_q = _pick_tile_q(S, block_q, sublane)
    n_q = pl.cdiv(S, tile_q)

    if vmem_limit_bytes is None:
        vmem_limit_bytes = _default_vmem_limit()

    x_c = x.astype(cdt)

    def _const_spec(arr):
        nd = arr.ndim
        return pl.BlockSpec(arr.shape, lambda b, i, nd=nd: (0,) * nd)

    kernel = functools.partial(encoder_layer_kernel, n_head=n_head, d_k=d_k,
                               d_v=d_v, tile_q=tile_q, compute_dtype=cdt)

    out, attn = pl.pallas_call(
        kernel,
        out_shape=(
            jax.ShapeDtypeStruct((B, S, D), out_dtype),
            jax.ShapeDtypeStruct((B, n_head, S, S), attn_dtype),
        ),
        grid_spec=pltpu.PrefetchScalarGridSpec(
            num_scalar_prefetch=0,
            grid=(B, n_q),
            in_specs=[
                # Single x input: block index depends only on b, so it is
                # fetched once per batch element; q-tiles are sliced in-kernel.
                pl.BlockSpec((1, S, D), lambda b, i: (b, 0, 0)),
            ] + [_const_spec(a) for a in weights],
            out_specs=[
                pl.BlockSpec((1, tile_q, D), lambda b, i: (b, i, 0)),
                pl.BlockSpec((1, n_head, tile_q, S), lambda b, i: (b, 0, i, 0)),
            ],
            scratch_shapes=[
                pltpu.VMEM((S, n_head * d_k), cdt),   # K, lane-dense, reused across q-tiles
                pltpu.VMEM((S, n_head * d_v), cdt),   # V
            ],
        ),
        compiler_params=pltpu.CompilerParams(
            # q-tile axis is "arbitrary": K/V scratch computed at i==0 is reused.
            dimension_semantics=("parallel", "arbitrary"),
            vmem_limit_bytes=vmem_limit_bytes,
        ),
    )(x_c, *weights)
    return out, attn


# ----------------------------- pure-JAX reference -----------------------------
def _ln_ref(x, gamma, beta, eps=1e-6):
    mu = jnp.mean(x, axis=-1, keepdims=True)
    var = jnp.mean((x - mu) ** 2, axis=-1, keepdims=True)
    return (x - mu) / jnp.sqrt(var + eps) * gamma + beta


def _reference(x, p, n_head, d_k, d_v):
    B, S, D = x.shape
    q = (x @ p['wq']).reshape(B, S, n_head, d_k).transpose(0, 2, 1, 3)
    k = (x @ p['wk']).reshape(B, S, n_head, d_k).transpose(0, 2, 1, 3)
    v = (x @ p['wv']).reshape(B, S, n_head, d_v).transpose(0, 2, 1, 3)
    scores = jnp.einsum('bhqd,bhkd->bhqk', q / (d_k ** 0.5), k)
    attn = jax.nn.softmax(scores, axis=-1)
    ctx = jnp.einsum('bhqk,bhkd->bhqd', attn, v).transpose(0, 2, 1, 3).reshape(B, S, -1)
    res1 = ctx @ p['wfc'] + x
    h1 = _ln_ref(res1, p['ln1_g'][0], p['ln1_b'][0])
    ff = jnp.maximum(h1 @ p['w1'] + p['b1'][0], 0.0) @ p['w2'] + p['b2'][0]
    out = _ln_ref(ff + h1, p['ln2_g'][0], p['ln2_b'][0])
    return out, attn


if __name__ == "__main__":
    # Small, module-consistent shapes.
    B, S = 2, 8
    d_model, d_inner = 32, 64
    n_head, d_k, d_v = 4, 8, 8

    key = jax.random.PRNGKey(0)
    ks = jax.random.split(key, 10)
    scale = 0.1
    params = {
        'wq':  scale * jax.random.normal(ks[0], (d_model, n_head * d_k), jnp.float32),
        'wk':  scale * jax.random.normal(ks[1], (d_model, n_head * d_k), jnp.float32),
        'wv':  scale * jax.random.normal(ks[2], (d_model, n_head * d_v), jnp.float32),
        'wfc': scale * jax.random.normal(ks[3], (n_head * d_v, d_model), jnp.float32),
        'ln1_g': jnp.ones((1, d_model), jnp.float32),
        'ln1_b': jnp.zeros((1, d_model), jnp.float32),
        'w1':  scale * jax.random.normal(ks[4], (d_model, d_inner), jnp.float32),
        'b1':  scale * jax.random.normal(ks[5], (1, d_inner), jnp.float32),
        'w2':  scale * jax.random.normal(ks[6], (d_inner, d_model), jnp.float32),
        'b2':  scale * jax.random.normal(ks[7], (1, d_model), jnp.float32),
        'ln2_g': jnp.ones((1, d_model), jnp.float32),
        'ln2_b': jnp.zeros((1, d_model), jnp.float32),
    }
    x = jax.random.normal(ks[8], (B, S, d_model), jnp.float32)

    ref_out, ref_attn = _reference(x, params, n_head, d_k, d_v)

    # f32 matmul path: tight numerical check (single q-tile).
    out, attn = encoder_layer(x, params, n_head=n_head, d_k=d_k, d_v=d_v,
                              compute_dtype=jnp.float32, attn_dtype=jnp.float32)
    out, attn = jax.block_until_ready((out, attn))
    assert jnp.allclose(out, ref_out, rtol=5e-3, atol=5e-3), "f32 output mismatch"
    assert jnp.allclose(attn, ref_attn, rtol=5e-3, atol=5e-3), "f32 attn mismatch"

    # bf16 matmul + bf16 attn-writeback path (performance configuration): loose check.
    out_bf, attn_bf = encoder_layer(x, params, n_head=n_head, d_k=d_k, d_v=d_v,
                                    compute_dtype=jnp.bfloat16,
                                    attn_dtype=jnp.bfloat16)
    out_bf, attn_bf = jax.block_until_ready((out_bf, attn_bf))
    assert jnp.allclose(out_bf, ref_out, rtol=5e-2, atol=5e-2), "bf16 output mismatch"
    assert jnp.allclose(attn_bf.astype(jnp.float32), ref_attn,
                        rtol=5e-2, atol=5e-2), "bf16 attn mismatch"

    # Multi-q-tile path (exercises the in-kernel pl.ds slice and K/V scratch reuse).
    S2 = 32
    x2 = jax.random.normal(ks[9], (B, S2, d_model), jnp.float32)
    ref_out2, ref_attn2 = _reference(x2, params, n_head, d_k, d_v)
    out2, attn2 = encoder_layer(x2, params, n_head=n_head, d_k=d_k, d_v=d_v,
                                block_q=16,
                                compute_dtype=jnp.float32, attn_dtype=jnp.float32)
    out2, attn2 = jax.block_until_ready((out2, attn2))
    assert jnp.allclose(out2, ref_out2, rtol=5e-3, atol=5e-3), "tiled output mismatch"
    assert jnp.allclose(attn2, ref_attn2, rtol=5e-3, atol=5e-3), "tiled attn mismatch"

    print("KERNEL_OK")
</pallas_src>

<mosaic_0001>
module attributes {stable_mosaic.version = 11 : i64} {
  func.func @encoder_layer_kernel(%arg0: i32, %arg1: i32, %arg2: memref<1x8x32xf32, #tpu.memory_space<vmem>>, %arg3: memref<32x32xf32, #tpu.memory_space<vmem>>, %arg4: memref<32x32xf32, #tpu.memory_space<vmem>>, %arg5: memref<32x32xf32, #tpu.memory_space<vmem>>, %arg6: memref<32x32xf32, #tpu.memory_space<vmem>>, %arg7: memref<1x32xf32, #tpu.memory_space<vmem>>, %arg8: memref<1x32xf32, #tpu.memory_space<vmem>>, %arg9: memref<32x64xf32, #tpu.memory_space<vmem>>, %arg10: memref<1x64xf32, #tpu.memory_space<vmem>>, %arg11: memref<64x32xf32, #tpu.memory_space<vmem>>, %arg12: memref<1x32xf32, #tpu.memory_space<vmem>>, %arg13: memref<1x32xf32, #tpu.memory_space<vmem>>, %arg14: memref<1x32xf32, #tpu.memory_space<vmem>>, %arg15: memref<1x8x32xf32, #tpu.memory_space<vmem>>, %arg16: memref<1x4x8x8xf32, #tpu.memory_space<vmem>>, %arg17: memref<8x32xf32, #tpu.memory_space<vmem>>, %arg18: memref<8x32xf32, #tpu.memory_space<vmem>>) attributes {dimension_semantics = [#tpu.dimension_semantics<parallel>, #tpu.dimension_semantics<arbitrary>], iteration_bounds = array<i64: 2, 1>, scalar_prefetch = 0 : i64, scratch_operands = 2 : i64, tpu.core_type = #tpu.core_type<tc>, window_params = [{transform_indices = @transform_0, window_bounds = array<i64: 1, 8, 32>}, {pipeline_mode = #tpu.pipeline_mode<synchronous>, transform_indices = @transform_1, window_bounds = array<i64: 32, 32>}, {pipeline_mode = #tpu.pipeline_mode<synchronous>, transform_indices = @transform_2, window_bounds = array<i64: 32, 32>}, {pipeline_mode = #tpu.pipeline_mode<synchronous>, transform_indices = @transform_3, window_bounds = array<i64: 32, 32>}, {pipeline_mode = #tpu.pipeline_mode<synchronous>, transform_indices = @transform_4, window_bounds = array<i64: 32, 32>}, {pipeline_mode = #tpu.pipeline_mode<synchronous>, transform_indices = @transform_5, window_bounds = array<i64: 1, 32>}, {pipeline_mode = #tpu.pipeline_mode<synchronous>, transform_indices = @transform_6, window_bounds = array<i64: 1, 32>}, {pipeline_mode = #tpu.pipeline_mode<synchronous>, transform_indices = @transform_7, window_bounds = array<i64: 32, 64>}, {pipeline_mode = #tpu.pipeline_mode<synchronous>, transform_indices = @transform_8, window_bounds = array<i64: 1, 64>}, {pipeline_mode = #tpu.pipeline_mode<synchronous>, transform_indices = @transform_9, window_bounds = array<i64: 64, 32>}, {pipeline_mode = #tpu.pipeline_mode<synchronous>, transform_indices = @transform_10, window_bounds = array<i64: 1, 32>}, {pipeline_mode = #tpu.pipeline_mode<synchronous>, transform_indices = @transform_11, window_bounds = array<i64: 1, 32>}, {pipeline_mode = #tpu.pipeline_mode<synchronous>, transform_indices = @transform_12, window_bounds = array<i64: 1, 32>}, {transform_indices = @transform_13, window_bounds = array<i64: 1, 8, 32>}, {transform_indices = @transform_14, window_bounds = array<i64: 1, 4, 8, 8>}]} {
    %c0_i32 = arith.constant 0 : i32
    %0 = arith.cmpi eq, %arg1, %c0_i32 : i32
    %1 = arith.extui %0 : i1 to i32
    %c0_i32_0 = arith.constant 0 : i32
    %2 = arith.cmpi ne, %1, %c0_i32_0 : i32
    scf.if %2 {
      %c0_73 = arith.constant 0 : index
      %c0_74 = arith.constant 0 : index
      %c0_75 = arith.constant 0 : index
      %166 = vector.load %arg2[%c0_73, %c0_74, %c0_75] : memref<1x8x32xf32, #tpu.memory_space<vmem>>, vector<1x8x32xf32>
      %167 = vector.shape_cast %166 : vector<1x8x32xf32> to vector<8x32xf32>
      %c0_76 = arith.constant 0 : index
      %c0_77 = arith.constant 0 : index
      %168 = vector.load %arg4[%c0_76, %c0_77] : memref<32x32xf32, #tpu.memory_space<vmem>>, vector<32x32xf32>
      %cst_78 = arith.constant dense<0.000000e+00> : vector<8x32xf32>
      %169 = tpu.matmul %167, %168, %cst_78 {dimension_numbers = #tpu.dot_dimension_numbers<[1], [0], [0], [1], [0, 0, 1, 1], [], []>} : vector<8x32xf32>, vector<32x32xf32>, vector<8x32xf32> -> vector<8x32xf32>
      %c0_79 = arith.constant 0 : index
      %c0_80 = arith.constant 0 : index
      %170 = vector.load %arg17[%c0_79, %c0_80] : memref<8x32xf32, #tpu.memory_space<vmem>>, vector<8x32xf32>
      tpu.vector_store %arg17[%c0_79, %c0_80], %169 {strides = array<i32>} : memref<8x32xf32, #tpu.memory_space<vmem>>, vector<8x32xf32>,
      %c0_81 = arith.constant 0 : index
      %c0_82 = arith.constant 0 : index
      %171 = vector.load %arg5[%c0_81, %c0_82] : memref<32x32xf32, #tpu.memory_space<vmem>>, vector<32x32xf32>
      %cst_83 = arith.constant dense<0.000000e+00> : vector<8x32xf32>
      %172 = tpu.matmul %167, %171, %cst_83 {dimension_numbers = #tpu.dot_dimension_numbers<[1], [0], [0], [1], [0, 0, 1, 1], [], []>} : vector<8x32xf32>, vector<32x32xf32>, vector<8x32xf32> -> vector<8x32xf32>
      %c0_84 = arith.constant 0 : index
      %c0_85 = arith.constant 0 : index
      %173 = vector.load %arg18[%c0_84, %c0_85] : memref<8x32xf32, #tpu.memory_space<vmem>>, vector<8x32xf32>
      tpu.vector_store %arg18[%c0_84, %c0_85], %172 {strides = array<i32>} : memref<8x32xf32, #tpu.memory_space<vmem>>, vector<8x32xf32>,
    } else {
    }
    %c8_i32 = arith.constant 8 : i32
    %3 = arith.muli %arg1, %c8_i32 : i32
    %4 = tpu.assume_multiple %3, 8 : i32
    %c0 = arith.constant 0 : index
    %5 = arith.index_cast %4 : i32 to index
    %c0_1 = arith.constant 0 : index
    %6 = vector.load %arg2[%c0, %5, %c0_1] : memref<1x8x32xf32, #tpu.memory_space<vmem>>, vector<1x8x32xf32>
    %7 = vector.shape_cast %6 : vector<1x8x32xf32> to vector<8x32xf32>
    %c0_2 = arith.constant 0 : index
    %c0_3 = arith.constant 0 : index
    %8 = vector.load %arg3[%c0_2, %c0_3] : memref<32x32xf32, #tpu.memory_space<vmem>>, vector<32x32xf32>
    %cst = arith.constant dense<0.000000e+00> : vector<8x32xf32>
    %9 = tpu.matmul %7, %8, %cst {dimension_numbers = #tpu.dot_dimension_numbers<[1], [0], [0], [1], [0, 0, 1, 1], [], []>} : vector<8x32xf32>, vector<32x32xf32>, vector<8x32xf32> -> vector<8x32xf32>
    %cst_4 = arith.constant 0.353553385 : f32
    %10 = vector.broadcast %cst_4 : f32 to vector<8x32xf32>
    %11 = arith.mulf %9, %10 : vector<8x32xf32>
    %c0_5 = arith.constant 0 : index
    %c0_6 = arith.constant 0 : index
    %12 = vector.load %arg17[%c0_5, %c0_6] : memref<8x32xf32, #tpu.memory_space<vmem>>, vector<8x32xf32>
    %c0_7 = arith.constant 0 : index
    %c0_8 = arith.constant 0 : index
    %13 = vector.load %arg18[%c0_7, %c0_8] : memref<8x32xf32, #tpu.memory_space<vmem>>, vector<8x32xf32>
    %14 = vector.extract_strided_slice %11 {offsets = [0, 0], sizes = [8, 8], strides = [1, 1]} : vector<8x32xf32> to vector<8x8xf32>
    %15 = vector.extract_strided_slice %12 {offsets = [0, 0], sizes = [8, 8], strides = [1, 1]} : vector<8x32xf32> to vector<8x8xf32>
    %cst_9 = arith.constant dense<0.000000e+00> : vector<8x8xf32>
    %16 = tpu.matmul %14, %15, %cst_9 {dimension_numbers = #tpu.dot_dimension_numbers<[1], [1], [0], [0], [0, 0, 1, 0], [], []>} : vector<8x8xf32>, vector<8x8xf32>, vector<8x8xf32> -> vector<8x8xf32>
    %cst_10 = arith.constant dense<0xFF800000> : vector<8xf32>
    %17 = vector.multi_reduction <maximumf>, %16, %cst_10 [1] : vector<8x8xf32> to vector<8xf32>
    %18 = vector.shape_cast %17 : vector<8xf32> to vector<8x1xf32>
    %19 = vector.broadcast %18 : vector<8x1xf32> to vector<8x8xf32>
    %20 = arith.subf %16, %19 : vector<8x8xf32>
    %21 = math.exp %20 : vector<8x8xf32>
    %cst_11 = arith.constant dense<0.000000e+00> : vector<8xf32>
    %22 = vector.multi_reduction <add>, %21, %cst_11 [1] : vector<8x8xf32> to vector<8xf32>
    %23 = vector.shape_cast %22 : vector<8xf32> to vector<8x1xf32>
    %24 = tpu.reciprocal %23 : vector<8x1xf32> -> vector<8x1xf32>
    %25 = vector.broadcast %24 : vector<8x1xf32> to vector<8x8xf32>
    %26 = arith.mulf %21, %25 : vector<8x8xf32>
    %c0_12 = arith.constant 0 : index
    %c0_13 = arith.constant 0 : index
    %c0_14 = arith.constant 0 : index
    %c0_15 = arith.constant 0 : index
    %27 = vector.load %arg16[%c0_12, %c0_13, %c0_14, %c0_15] : memref<1x4x8x8xf32, #tpu.memory_space<vmem>>, vector<1x1x8x8xf32>
    %28 = vector.shape_cast %27 : vector<1x1x8x8xf32> to vector<8x8xf32>
    %29 = vector.shape_cast %26 : vector<8x8xf32> to vector<1x1x8x8xf32>
    tpu.vector_store %arg16[%c0_12, %c0_13, %c0_14, %c0_15], %29 {strides = array<i32>} : memref<1x4x8x8xf32, #tpu.memory_space<vmem>>, vector<1x1x8x8xf32>,
    %30 = vector.extract_strided_slice %13 {offsets = [0, 0], sizes = [8, 8], strides = [1, 1]} : vector<8x32xf32> to vector<8x8xf32>
    %cst_16 = arith.constant dense<0.000000e+00> : vector<8x8xf32>
    %31 = tpu.matmul %26, %30, %cst_16 {dimension_numbers = #tpu.dot_dimension_numbers<[1], [0], [0], [1], [0, 0, 1, 1], [], []>} : vector<8x8xf32>, vector<8x8xf32>, vector<8x8xf32> -> vector<8x8xf32>
    %32 = vector.extract_strided_slice %11 {offsets = [0, 8], sizes = [8, 8], strides = [1, 1]} : vector<8x32xf32> to vector<8x8xf32>
    %33 = vector.extract_strided_slice %12 {offsets = [0, 8], sizes = [8, 8], strides = [1, 1]} : vector<8x32xf32> to vector<8x8xf32>
    %cst_17 = arith.constant dense<0.000000e+00> : vector<8x8xf32>
    %34 = tpu.matmul %32, %33, %cst_17 {dimension_numbers = #tpu.dot_dimension_numbers<[1], [1], [0], [0], [0, 0, 1, 0], [], []>} : vector<8x8xf32>, vector<8x8xf32>, vector<8x8xf32> -> vector<8x8xf32>
    %cst_18 = arith.constant dense<0xFF800000> : vector<8xf32>
    %35 = vector.multi_reduction <maximumf>, %34, %cst_18 [1] : vector<8x8xf32> to vector<8xf32>
    %36 = vector.shape_cast %35 : vector<8xf32> to vector<8x1xf32>
    %37 = vector.broadcast %36 : vector<8x1xf32> to vector<8x8xf32>
    %38 = arith.subf %34, %37 : vector<8x8xf32>
    %39 = math.exp %38 : vector<8x8xf32>
    %cst_19 = arith.constant dense<0.000000e+00> : vector<8xf32>
    %40 = vector.multi_reduction <add>, %39, %cst_19 [1] : vector<8x8xf32> to vector<8xf32>
    %41 = vector.shape_cast %40 : vector<8xf32> to vector<8x1xf32>
    %42 = tpu.reciprocal %41 : vector<8x1xf32> -> vector<8x1xf32>
    %43 = vector.broadcast %42 : vector<8x1xf32> to vector<8x8xf32>
    %44 = arith.mulf %39, %43 : vector<8x8xf32>
    %c0_20 = arith.constant 0 : index
    %c1 = arith.constant 1 : index
    %c0_21 = arith.constant 0 : index
    %c0_22 = arith.constant 0 : index
    %45 = vector.load %arg16[%c0_20, %c1, %c0_21, %c0_22] : memref<1x4x8x8xf32, #tpu.memory_space<vmem>>, vector<1x1x8x8xf32>
    %46 = vector.shape_cast %45 : vector<1x1x8x8xf32> to vector<8x8xf32>
    %47 = vector.shape_cast %44 : vector<8x8xf32> to vector<1x1x8x8xf32>
    tpu.vector_store %arg16[%c0_20, %c1, %c0_21, %c0_22], %47 {strides = array<i32>} : memref<1x4x8x8xf32, #tpu.memory_space<vmem>>, vector<1x1x8x8xf32>,
    %48 = vector.extract_strided_slice %13 {offsets = [0, 8], sizes = [8, 8], strides = [1, 1]} : vector<8x32xf32> to vector<8x8xf32>
    %cst_23 = arith.constant dense<0.000000e+00> : vector<8x8xf32>
    %49 = tpu.matmul %44, %48, %cst_23 {dimension_numbers = #tpu.dot_dimension_numbers<[1], [0], [0], [1], [0, 0, 1, 1], [], []>} : vector<8x8xf32>, vector<8x8xf32>, vector<8x8xf32> -> vector<8x8xf32>
    %50 = vector.extract_strided_slice %11 {offsets = [0, 16], sizes = [8, 8], strides = [1, 1]} : vector<8x32xf32> to vector<8x8xf32>
    %51 = vector.extract_strided_slice %12 {offsets = [0, 16], sizes = [8, 8], strides = [1, 1]} : vector<8x32xf32> to vector<8x8xf32>
    %cst_24 = arith.constant dense<0.000000e+00> : vector<8x8xf32>
    %52 = tpu.matmul %50, %51, %cst_24 {dimension_numbers = #tpu.dot_dimension_numbers<[1], [1], [0], [0], [0, 0, 1, 0], [], []>} : vector<8x8xf32>, vector<8x8xf32>, vector<8x8xf32> -> vector<8x8xf32>
    %cst_25 = arith.constant dense<0xFF800000> : vector<8xf32>
    %53 = vector.multi_reduction <maximumf>, %52, %cst_25 [1] : vector<8x8xf32> to vector<8xf32>
    %54 = vector.shape_cast %53 : vector<8xf32> to vector<8x1xf32>
    %55 = vector.broadcast %54 : vector<8x1xf32> to vector<8x8xf32>
    %56 = arith.subf %52, %55 : vector<8x8xf32>
    %57 = math.exp %56 : vector<8x8xf32>
    %cst_26 = arith.constant dense<0.000000e+00> : vector<8xf32>
    %58 = vector.multi_reduction <add>, %57, %cst_26 [1] : vector<8x8xf32> to vector<8xf32>
    %59 = vector.shape_cast %58 : vector<8xf32> to vector<8x1xf32>
    %60 = tpu.reciprocal %59 : vector<8x1xf32> -> vector<8x1xf32>
    %61 = vector.broadcast %60 : vector<8x1xf32> to vector<8x8xf32>
    %62 = arith.mulf %57, %61 : vector<8x8xf32>
    %c0_27 = arith.constant 0 : index
    %c2 = arith.constant 2 : index
    %c0_28 = arith.constant 0 : index
    %c0_29 = arith.constant 0 : index
    %63 = vector.load %arg16[%c0_27, %c2, %c0_28, %c0_29] : memref<1x4x8x8xf32, #tpu.memory_space<vmem>>, vector<1x1x8x8xf32>
    %64 = vector.shape_cast %63 : vector<1x1x8x8xf32> to vector<8x8xf32>
    %65 = vector.shape_cast %62 : vector<8x8xf32> to vector<1x1x8x8xf32>
    tpu.vector_store %arg16[%c0_27, %c2, %c0_28, %c0_29], %65 {strides = array<i32>} : memref<1x4x8x8xf32, #tpu.memory_space<vmem>>, vector<1x1x8x8xf32>,
    %66 = vector.extract_strided_slice %13 {offsets = [0, 16], sizes = [8, 8], strides = [1, 1]} : vector<8x32xf32> to vector<8x8xf32>
    %cst_30 = arith.constant dense<0.000000e+00> : vector<8x8xf32>
    %67 = tpu.matmul %62, %66, %cst_30 {dimension_numbers = #tpu.dot_dimension_numbers<[1], [0], [0], [1], [0, 0, 1, 1], [], []>} : vector<8x8xf32>, vector<8x8xf32>, vector<8x8xf32> -> vector<8x8xf32>
    %68 = vector.extract_strided_slice %11 {offsets = [0, 24], sizes = [8, 8], strides = [1, 1]} : vector<8x32xf32> to vector<8x8xf32>
    %69 = vector.extract_strided_slice %12 {offsets = [0, 24], sizes = [8, 8], strides = [1, 1]} : vector<8x32xf32> to vector<8x8xf32>
    %cst_31 = arith.constant dense<0.000000e+00> : vector<8x8xf32>
    %70 = tpu.matmul %68, %69, %cst_31 {dimension_numbers = #tpu.dot_dimension_numbers<[1], [1], [0], [0], [0, 0, 1, 0], [], []>} : vector<8x8xf32>, vector<8x8xf32>, vector<8x8xf32> -> vector<8x8xf32>
    %cst_32 = arith.constant dense<0xFF800000> : vector<8xf32>
    %71 = vector.multi_reduction <maximumf>, %70, %cst_32 [1] : vector<8x8xf32> to vector<8xf32>
    %72 = vector.shape_cast %71 : vector<8xf32> to vector<8x1xf32>
    %73 = vector.broadcast %72 : vector<8x1xf32> to vector<8x8xf32>
    %74 = arith.subf %70, %73 : vector<8x8xf32>
    %75 = math.exp %74 : vector<8x8xf32>
    %cst_33 = arith.constant dense<0.000000e+00> : vector<8xf32>
    %76 = vector.multi_reduction <add>, %75, %cst_33 [1] : vector<8x8xf32> to vector<8xf32>
    %77 = vector.shape_cast %76 : vector<8xf32> to vector<8x1xf32>
    %78 = tpu.reciprocal %77 : vector<8x1xf32> -> vector<8x1xf32>
    %79 = vector.broadcast %78 : vector<8x1xf32> to vector<8x8xf32>
    %80 = arith.mulf %75, %79 : vector<8x8xf32>
    %c0_34 = arith.constant 0 : index
    %c3 = arith.constant 3 : index
    %c0_35 = arith.constant 0 : index
    %c0_36 = arith.constant 0 : index
    %81 = vector.load %arg16[%c0_34, %c3, %c0_35, %c0_36] : memref<1x4x8x8xf32, #tpu.memory_space<vmem>>, vector<1x1x8x8xf32>
    %82 = vector.shape_cast %81 : vector<1x1x8x8xf32> to vector<8x8xf32>
    %83 = vector.shape_cast %80 : vector<8x8xf32> to vector<1x1x8x8xf32>
    tpu.vector_store %arg16[%c0_34, %c3, %c0_35, %c0_36], %83 {strides = array<i32>} : memref<1x4x8x8xf32, #tpu.memory_space<vmem>>, vector<1x1x8x8xf32>,
    %84 = vector.extract_strided_slice %13 {offsets = [0, 24], sizes = [8, 8], strides = [1, 1]} : vector<8x32xf32> to vector<8x8xf32>
    %cst_37 = arith.constant dense<0.000000e+00> : vector<8x8xf32>
    %85 = tpu.matmul %80, %84, %cst_37 {dimension_numbers = #tpu.dot_dimension_numbers<[1], [0], [0], [1], [0, 0, 1, 1], [], []>} : vector<8x8xf32>, vector<8x8xf32>, vector<8x8xf32> -> vector<8x8xf32>
    %86 = tpu.concatenate %31, %49, %67, %85 in 1 : vector<8x8xf32>, vector<8x8xf32>, vector<8x8xf32>, vector<8x8xf32> -> vector<8x32xf32>
    %c0_38 = arith.constant 0 : index
    %c0_39 = arith.constant 0 : index
    %87 = vector.load %arg6[%c0_38, %c0_39] : memref<32x32xf32, #tpu.memory_space<vmem>>, vector<32x32xf32>
    %cst_40 = arith.constant dense<0.000000e+00> : vector<8x32xf32>
    %88 = tpu.matmul %86, %87, %cst_40 {dimension_numbers = #tpu.dot_dimension_numbers<[1], [0], [0], [1], [0, 0, 1, 1], [], []>} : vector<8x32xf32>, vector<32x32xf32>, vector<8x32xf32> -> vector<8x32xf32>
    %89 = arith.addf %88, %7 : vector<8x32xf32>
    %c0_41 = arith.constant 0 : index
    %c0_42 = arith.constant 0 : index
    %90 = vector.load %arg7[%c0_41, %c0_42] : memref<1x32xf32, #tpu.memory_space<vmem>>, vector<1x32xf32>
    %91 = vector.shape_cast %90 : vector<1x32xf32> to vector<32xf32>
    %c0_43 = arith.constant 0 : index
    %c0_44 = arith.constant 0 : index
    %92 = vector.load %arg8[%c0_43, %c0_44] : memref<1x32xf32, #tpu.memory_space<vmem>>, vector<1x32xf32>
    %93 = vector.shape_cast %92 : vector<1x32xf32> to vector<32xf32>
    %cst_45 = arith.constant dense<0.000000e+00> : vector<8xf32>
    %94 = vector.multi_reduction <add>, %89, %cst_45 [1] : vector<8x32xf32> to vector<8xf32>
    %95 = vector.shape_cast %94 : vector<8xf32> to vector<8x1xf32>
    %cst_46 = arith.constant 3.200000e+01 : f32
    %96 = vector.broadcast %cst_46 : f32 to vector<8x1xf32>
    %97 = arith.divf %95, %96 : vector<8x1xf32>
    %98 = vector.broadcast %97 : vector<8x1xf32> to vector<8x32xf32>
    %99 = arith.subf %89, %98 : vector<8x32xf32>
    %100 = arith.mulf %99, %99 : vector<8x32xf32>
    %cst_47 = arith.constant dense<0.000000e+00> : vector<8xf32>
    %101 = vector.multi_reduction <add>, %100, %cst_47 [1] : vector<8x32xf32> to vector<8xf32>
    %102 = vector.shape_cast %101 : vector<8xf32> to vector<8x1xf32>
    %cst_48 = arith.constant 3.200000e+01 : f32
    %103 = vector.broadcast %cst_48 : f32 to vector<8x1xf32>
    %104 = arith.divf %102, %103 : vector<8x1xf32>
    %105 = vector.broadcast %97 : vector<8x1xf32> to vector<8x32xf32>
    %106 = arith.subf %89, %105 : vector<8x32xf32>
    %cst_49 = arith.constant 9.99999997E-7 : f32
    %107 = vector.broadcast %cst_49 : f32 to vector<8x1xf32>
    %108 = arith.addf %104, %107 : vector<8x1xf32>
    %109 = math.rsqrt %108 : vector<8x1xf32>
    %110 = vector.broadcast %109 : vector<8x1xf32> to vector<8x32xf32>
    %111 = arith.mulf %106, %110 : vector<8x32xf32>
    %112 = vector.shape_cast %91 : vector<32xf32> to vector<1x32xf32>
    %113 = vector.broadcast %112 : vector<1x32xf32> to vector<8x32xf32>
    %114 = arith.mulf %111, %113 : vector<8x32xf32>
    %115 = vector.shape_cast %93 : vector<32xf32> to vector<1x32xf32>
    %116 = vector.broadcast %115 : vector<1x32xf32> to vector<8x32xf32>
    %117 = arith.addf %114, %116 : vector<8x32xf32>
    %c0_50 = arith.constant 0 : index
    %c0_51 = arith.constant 0 : index
    %118 = vector.load %arg9[%c0_50, %c0_51] : memref<32x64xf32, #tpu.memory_space<vmem>>, vector<32x64xf32>
    %cst_52 = arith.constant dense<0.000000e+00> : vector<8x64xf32>
    %119 = tpu.matmul %117, %118, %cst_52 {dimension_numbers = #tpu.dot_dimension_numbers<[1], [0], [0], [1], [0, 0, 1, 1], [], []>} : vector<8x32xf32>, vector<32x64xf32>, vector<8x64xf32> -> vector<8x64xf32>
    %c0_53 = arith.constant 0 : index
    %c0_54 = arith.constant 0 : index
    %120 = vector.load %arg10[%c0_53, %c0_54] : memref<1x64xf32, #tpu.memory_space<vmem>>, vector<1x64xf32>
    %121 = vector.shape_cast %120 : vector<1x64xf32> to vector<64xf32>
    %122 = vector.shape_cast %121 : vector<64xf32> to vector<1x64xf32>
    %123 = vector.broadcast %122 : vector<1x64xf32> to vector<8x64xf32>
    %124 = arith.addf %119, %123 : vector<8x64xf32>
    %cst_55 = arith.constant 0.000000e+00 : f32
    %125 = vector.broadcast %cst_55 : f32 to vector<8x64xf32>
    %126 = arith.maximumf %124, %125 : vector<8x64xf32>
    %c0_56 = arith.constant 0 : index
    %c0_57 = arith.constant 0 : index
    %127 = vector.load %arg11[%c0_56, %c0_57] : memref<64x32xf32, #tpu.memory_space<vmem>>, vector<64x32xf32>
    %cst_58 = arith.constant dense<0.000000e+00> : vector<8x32xf32>
    %128 = tpu.matmul %126, %127, %cst_58 {dimension_numbers = #tpu.dot_dimension_numbers<[1], [0], [0], [1], [0, 0, 1, 1], [], []>} : vector<8x64xf32>, vector<64x32xf32>, vector<8x32xf32> -> vector<8x32xf32>
    %c0_59 = arith.constant 0 : index
    %c0_60 = arith.constant 0 : index
    %129 = vector.load %arg12[%c0_59, %c0_60] : memref<1x32xf32, #tpu.memory_space<vmem>>, vector<1x32xf32>
    %130 = vector.shape_cast %129 : vector<1x32xf32> to vector<32xf32>
    %131 = vector.shape_cast %130 : vector<32xf32> to vector<1x32xf32>
    %132 = vector.broadcast %131 : vector<1x32xf32> to vector<8x32xf32>
    %133 = arith.addf %128, %132 : vector<8x32xf32>
    %134 = arith.addf %133, %117 : vector<8x32xf32>
    %c0_61 = arith.constant 0 : index
    %c0_62 = arith.constant 0 : index
    %135 = vector.load %arg13[%c0_61, %c0_62] : memref<1x32xf32, #tpu.memory_space<vmem>>, vector<1x32xf32>
    %136 = vector.shape_cast %135 : vector<1x32xf32> to vector<32xf32>
    %c0_63 = arith.constant 0 : index
    %c0_64 = arith.constant 0 : index
    %137 = vector.load %arg14[%c0_63, %c0_64] : memref<1x32xf32, #tpu.memory_space<vmem>>, vector<1x32xf32>
    %138 = vector.shape_cast %137 : vector<1x32xf32> to vector<32xf32>
    %cst_65 = arith.constant dense<0.000000e+00> : vector<8xf32>
    %139 = vector.multi_reduction <add>, %134, %cst_65 [1] : vector<8x32xf32> to vector<8xf32>
    %140 = vector.shape_cast %139 : vector<8xf32> to vector<8x1xf32>
    %cst_66 = arith.constant 3.200000e+01 : f32
    %141 = vector.broadcast %cst_66 : f32 to vector<8x1xf32>
    %142 = arith.divf %140, %141 : vector<8x1xf32>
    %143 = vector.broadcast %142 : vector<8x1xf32> to vector<8x32xf32>
    %144 = arith.subf %134, %143 : vector<8x32xf32>
    %145 = arith.mulf %144, %144 : vector<8x32xf32>
    %cst_67 = arith.constant dense<0.000000e+00> : vector<8xf32>
    %146 = vector.multi_reduction <add>, %145, %cst_67 [1] : vector<8x32xf32> to vector<8xf32>
    %147 = vector.shape_cast %146 : vector<8xf32> to vector<8x1xf32>
    %cst_68 = arith.constant 3.200000e+01 : f32
    %148 = vector.broadcast %cst_68 : f32 to vector<8x1xf32>
    %149 = arith.divf %147, %148 : vector<8x1xf32>
    %150 = vector.broadcast %142 : vector<8x1xf32> to vector<8x32xf32>
    %151 = arith.subf %134, %150 : vector<8x32xf32>
    %cst_69 = arith.constant 9.99999997E-7 : f32
    %152 = vector.broadcast %cst_69 : f32 to vector<8x1xf32>
    %153 = arith.addf %149, %152 : vector<8x1xf32>
    %154 = math.rsqrt %153 : vector<8x1xf32>
    %155 = vector.broadcast %154 : vector<8x1xf32> to vector<8x32xf32>
    %156 = arith.mulf %151, %155 : vector<8x32xf32>
    %157 = vector.shape_cast %136 : vector<32xf32> to vector<1x32xf32>
    %158 = vector.broadcast %157 : vector<1x32xf32> to vector<8x32xf32>
    %159 = arith.mulf %156, %158 : vector<8x32xf32>
    %160 = vector.shape_cast %138 : vector<32xf32> to vector<1x32xf32>
    %161 = vector.broadcast %160 : vector<1x32xf32> to vector<8x32xf32>
    %162 = arith.addf %159, %161 : vector<8x32xf32>
    %c0_70 = arith.constant 0 : index
    %c0_71 = arith.constant 0 : index
    %c0_72 = arith.constant 0 : index
    %163 = vector.load %arg15[%c0_70, %c0_71, %c0_72] : memref<1x8x32xf32, #tpu.memory_space<vmem>>, vector<1x8x32xf32>
    %164 = vector.shape_cast %163 : vector<1x8x32xf32> to vector<8x32xf32>
    %165 = vector.shape_cast %162 : vector<8x32xf32> to vector<1x8x32xf32>
    tpu.vector_store %arg15[%c0_70, %c0_71, %c0_72], %165 {strides = array<i32>} : memref<1x8x32xf32, #tpu.memory_space<vmem>>, vector<1x8x32xf32>,
    return
  }
  func.func @transform_0(%arg0: i32, %arg1: i32) -> (i32, i32, i32) {
    %c0_i32 = arith.constant 0 : i32
    %c0_i32_0 = arith.constant 0 : i32
    %c0_i32_1 = arith.constant 0 : i32
    return %arg0, %c0_i32, %c0_i32_0 : i32, i32, i32
  }
  func.func @transform_1(%arg0: i32, %arg1: i32) -> (i32, i32) {
    %c0_i32 = arith.constant 0 : i32
    %c0_i32_0 = arith.constant 0 : i32
    %c0_i32_1 = arith.constant 0 : i32
    return %c0_i32, %c0_i32_0 : i32, i32
  }
  func.func @transform_2(%arg0: i32, %arg1: i32) -> (i32, i32) {
    %c0_i32 = arith.constant 0 : i32
    %c0_i32_0 = arith.constant 0 : i32
    %c0_i32_1 = arith.constant 0 : i32
    return %c0_i32, %c0_i32_0 : i32, i32
  }
  func.func @transform_3(%arg0: i32, %arg1: i32) -> (i32, i32) {
    %c0_i32 = arith.constant 0 : i32
    %c0_i32_0 = arith.constant 0 : i32
    %c0_i32_1 = arith.constant 0 : i32
    return %c0_i32, %c0_i32_0 : i32, i32
  }
  func.func @transform_4(%arg0: i32, %arg1: i32) -> (i32, i32) {
    %c0_i32 = arith.constant 0 : i32
    %c0_i32_0 = arith.constant 0 : i32
    %c0_i32_1 = arith.constant 0 : i32
    return %c0_i32, %c0_i32_0 : i32, i32
  }
  func.func @transform_5(%arg0: i32, %arg1: i32) -> (i32, i32) {
    %c0_i32 = arith.constant 0 : i32
    %c0_i32_0 = arith.constant 0 : i32
    %c0_i32_1 = arith.constant 0 : i32
    return %c0_i32, %c0_i32_0 : i32, i32
  }
  func.func @transform_6(%arg0: i32, %arg1: i32) -> (i32, i32) {
    %c0_i32 = arith.constant 0 : i32
    %c0_i32_0 = arith.constant 0 : i32
    %c0_i32_1 = arith.constant 0 : i32
    return %c0_i32, %c0_i32_0 : i32, i32
  }
  func.func @transform_7(%arg0: i32, %arg1: i32) -> (i32, i32) {
    %c0_i32 = arith.constant 0 : i32
    %c0_i32_0 = arith.constant 0 : i32
    %c0_i32_1 = arith.constant 0 : i32
    return %c0_i32, %c0_i32_0 : i32, i32
  }
  func.func @transform_8(%arg0: i32, %arg1: i32) -> (i32, i32) {
    %c0_i32 = arith.constant 0 : i32
    %c0_i32_0 = arith.constant 0 : i32
    %c0_i32_1 = arith.constant 0 : i32
    return %c0_i32, %c0_i32_0 : i32, i32
  }
  func.func @transform_9(%arg0: i32, %arg1: i32) -> (i32, i32) {
    %c0_i32 = arith.constant 0 : i32
    %c0_i32_0 = arith.constant 0 : i32
    %c0_i32_1 = arith.constant 0 : i32
    return %c0_i32, %c0_i32_0 : i32, i32
  }
  func.func @transform_10(%arg0: i32, %arg1: i32) -> (i32, i32) {
    %c0_i32 = arith.constant 0 : i32
    %c0_i32_0 = arith.constant 0 : i32
    %c0_i32_1 = arith.constant 0 : i32
    return %c0_i32, %c0_i32_0 : i32, i32
  }
  func.func @transform_11(%arg0: i32, %arg1: i32) -> (i32, i32) {
    %c0_i32 = arith.constant 0 : i32
    %c0_i32_0 = arith.constant 0 : i32
    %c0_i32_1 = arith.constant 0 : i32
    return %c0_i32, %c0_i32_0 : i32, i32
  }
  func.func @transform_12(%arg0: i32, %arg1: i32) -> (i32, i32) {
    %c0_i32 = arith.constant 0 : i32
    %c0_i32_0 = arith.constant 0 : i32
    %c0_i32_1 = arith.constant 0 : i32
    return %c0_i32, %c0_i32_0 : i32, i32
  }
  func.func @transform_13(%arg0: i32, %arg1: i32) -> (i32, i32, i32) {
    %c0_i32 = arith.constant 0 : i32
    %c0_i32_0 = arith.constant 0 : i32
    return %arg0, %arg1, %c0_i32 : i32, i32, i32
  }
  func.func @transform_14(%arg0: i32, %arg1: i32) -> (i32, i32, i32, i32) {
    %c0_i32 = arith.constant 0 : i32
    %c0_i32_0 = arith.constant 0 : i32
    %c0_i32_1 = arith.constant 0 : i32
    return %arg0, %c0_i32, %arg1, %c0_i32_0 : i32, i32, i32, i32
  }
}

</mosaic_0001>

<bundles_post_ra>
// kernel: tpu_custom_call.1
= control target key start
LH: loop header
LB: loop body
LE: loop exit
PB: predicated region body
PF: predicated region fallthrough
CT: control target
= control target key end

     0   :  { %s2978_s0 = inlined_call_operand.hbm [shape: f32[2,8,32], index: 0, kind: input, shape index: {}]   ;;  %s2979_s1 = inlined_call_operand.vmem [shape: f32[32,32], index: 1, kind: input, shape index: {}]   ;;  %s2980_s2 = inlined_call_operand.vmem [shape: f32[32,32], index: 2, kind: input, shape index: {}]   ;;  %s2981_s3 = inlined_call_operand.vmem [shape: f32[32,32], index: 3, kind: input, shape index: {}]   ;;  %s2982_s4 = inlined_call_operand.hbm [shape: f32[32,32], index: 4, kind: input, shape index: {}]   ;;  %s2983_s5 = inlined_call_operand.vmem [shape: f32[1,32], index: 5, kind: input, shape index: {}]   ;;  %s2984_s6 = inlined_call_operand.vmem [shape: f32[1,32], index: 6, kind: input, shape index: {}]   ;;  %s2985_s7 = inlined_call_operand.hbm [shape: f32[32,64], index: 7, kind: input, shape index: {}]   ;;  %s2986_s8 = inlined_call_operand.vmem [shape: f32[1,64], index: 8, kind: input, shape index: {}]   ;;  %s2987_s9 = inlined_call_operand.vmem [shape: f32[64,32], index: 9, kind: input, shape index: {}]   ;;  %s2988_s10 = inlined_call_operand.vmem [shape: f32[1,32], index: 10, kind: input, shape index: {}]   ;;  %s2989_s11 = inlined_call_operand.vmem [shape: f32[1,32], index: 11, kind: input, shape index: {}]   ;;  %s2990_s12 = inlined_call_operand.vmem [shape: f32[1,32], index: 12, kind: input, shape index: {}]   ;;  %s2991_s13 = inlined_call_operand.hbm [shape: f32[2,8,32], index: 13, kind: output, shape index: {0}]   ;;  %s2992_s14 = inlined_call_operand.hbm [shape: f32[2,4,8,8], index: 14, kind: output, shape index: {1}]  }
   0x1   :  { %3002 = sst [smem:[#allocation21_spill]] %s2982_s4 }
   0x2   :  { %3003 = sst [smem:[#allocation22_spill]] %s2985_s7 }
   0x3   :  { %3004 = sst [smem:[#allocation23_spill]] %s2989_s11 }
   0x4   :  { %3005 = sst [smem:[#allocation24_spill]] %s2990_s12 }
   0x5   :  { %3006 = sst [smem:[#allocation25_spill]] %s2991_s13 }
   0x6   :  { %3007 = sst [smem:[#allocation26_spill]] %s2992_s14 }
   0x7   :  { %20 = vsyncpa [#allocation5], 0 }
   0x8   :  { %22 = vsyncpa [#allocation5 + $0x1], 0 }
   0x9   :  { %23 = vsyncpa [#allocation8], 0 }
   0xa   :  { %24 = vsyncpa [#allocation6], 0 }
   0xb   :  { %26 = vsyncpa [#allocation6 + $0x1], 0 }
   0xc   :  { %27 = vsyncpa [#allocation12], 0 }
   0xd   :  { %29 = vsyncpa [#allocation12 + $0x1], 0  ;;  %s2565_s29 = smov 0   ;;  %s2567_s30 = smov 0  }
   0xe   :  { %s2569_s15 = smov 0   ;;  %s2571_s16 = smov 0  }
   0xf   :  { %s2573_s17 = smov 0   ;;  %s2575_s18 = smov 0  }
  0x10 LB: > { %3008 = sst [smem:[#allocation17_spill]] %s2452_s29  ;;  %s1946_s19 = sadd.s32 4294967295, %s2472_s18   ;;  %s2472_s18 = sphi %s2575_s18, %s35_s18   ;;  %s2468_s17 = sphi %s2573_s17, %s3033_s17   ;;  %s2464_s16 = sphi %s2571_s16, %s3032_s16   ;;  %s2460_s15 = sphi %s2569_s15, %s3036_s15   ;;  %s2456_s30 = sphi %s2567_s30, %s3035_s30   ;;  %s2452_s29 = sphi %s2565_s29, %s3034_s29  }
  0x11   : > { %3009 = sst [smem:[#allocation18_spill]] %s2468_s17  ;;  %s1947_s20 = sadd.s32 4294967294, %s2472_s18  }
  0x12   : > { %p67_p0 = scmp.ne.s32.totalorder %s2456_s30, %s2452_s29  ;;  %p2599_p1 = scmp.eq.s32.totalorder %s1946_s19, 0 }
  0x13   : > { %p2603_p2 = scmp.eq.s32.totalorder %s1946_s19, 1  ;;  %p351_p3 = scmp.eq.s32.totalorder %s1947_s20, 1 }
  0x14   : > { %s3010_s21 = scalar_select %p2599_p1, 1, 0 }
  0x15   : > { %p2609_p4 = por %p2599_p1, %p67_p0  ;;  %p1948_p5 = scmp.ge.s32.totalorder %s2472_s18, 1 }
  0x16   : > { %p2614_p6 = por %p351_p3, %p67_p0  ;;  %p386_p7 = scmp.lt.s32.totalorder %s2472_s18, 3 }
  0x17   : > { %s3012_s23 = scalar_select %p2609_p4, 1, 0 }
  0x18   : > { %s3013_s24 = scalar_select %p2614_p6, 1, 0 }
  0x19   : > { %p2619_p8 = pnand %p1948_p5, %p386_p7  ;;  %s2474_s26 = smov [#allocation7]  }
  0x1a   : > { %3014 = sst [smem:[#allocation19_spill]] %s3013_s24  ;;  %s407_s27 = sshll.u32 %s2474_s26, 4  ;;  %s408_s27 = int_to_ptr.vmem [resolvable:$true] %s407_s27 }
  0x1b   : > { %p2173_p9 = pneg %p2619_p8  ;;  %s2475_s19 = smov [#allocation9]  }
  0x1c   : > { %s426_s20 = sshll.u32 %s2475_s19, 4  ;;  %s2289_s24 = scalar_lea.vmem %s408_s27, 512  ;;  %s427_s20 = int_to_ptr.vmem [resolvable:$true] %s426_s20 }
  0x1d   : > { %p2628_p11 = pnand %p2173_p9, %p2599_p1  ;;  %p2290_p13 = scmp.ne.s32.totalorder %s408_s27, %s2289_s24 }
  0x1e   : > { %p2297_p5 = scmp.lt.s32.totalorder %s408_s27, %s408_s27  ;;  %p2298_p7 = scmp.lt.s32.totalorder %s2289_s24, %s2289_s24 }
  0x1f   : > { %p2280_p12 = pneg %p2628_p11 }
  0x20   : > { %p2299_p10 = por %p2298_p7, %p2297_p5 }
  0x21   : > { %p2292_p0 = pnand %p2290_p13, %p2280_p12 }
  0x23   : > { %p2293_p3 = pneg %p2292_p0 }
  0x25   : > { %p2300_p9 = pnand %p2299_p10, %p2293_p3 }
  0x27   : > { %2303 = shalt.err (!%p2300_p9)
}
  0x28   : > { %s2476_s26 = smov 128   ;;  %s2477_s29 = smov 8  }
  0x29   : > { %s3017_s4 = sld [smem:[#allocation21_spill]]  ;;  %s2315_s12 = scalar_lea.vmem %s427_s20, 512 }
  0x2a   : > { %p2316_p6 = scmp.ne.s32.totalorder %s427_s20, %s2315_s12  ;;  %p2323_p1 = scmp.lt.s32.totalorder %s427_s20, %s427_s20 }
  0x2b   : > { %p2324_p4 = scmp.lt.s32.totalorder %s2315_s12, %s2315_s12 }
  0x2c   : > { %p2318_p13 = pnand %p2316_p6, %p2280_p12 }
  0x2d   : > { %p2325_p5 = por %p2324_p4, %p2323_p1 }
  0x2e   : > { %p2319_p0 = pneg %p2318_p13 }
  0x2f   : > { %2176 = dma.hbm_to_vmem [thread:$0]  (!%p2628_p11), %s3017_s4, 512, %s408_s27, [#allocation8], %s2476_s26, %s2476_s26, %s2477_s29  }
  0x30   : > { %p2326_p10 = pnand %p2325_p5, %p2319_p0 }
  0x32   : > { %2329 = shalt.err (!%p2326_p10)
}
  0x33   : > { %s3018_s7 = sld [smem:[#allocation22_spill]]  ;;  %s47_s12 = sadd.s32 1, %s2468_s17 }
  0x34   : > { %s54_s13 = sadd.s32 1, %s2460_s15  ;;  %p49_p1 = scmp.ge.s32.totalorder %s47_s12, 2 }
  0x35   : > { %p61_p4 = scmp.ne.s32.totalorder %s2460_s15, %s2456_s30  ;;  %p62_p6 = scmp.eq.s32.totalorder %s2472_s18, 0 }
  0x36   : > { %p2193_p12 = scmp.lt.s32.totalorder %s2472_s18, 2  ;;  %s3038_s12 = smov (%p49_p1, %s47_s12), 0 }
  0x37   : > { %3019 = sst [smem:[#allocation20_spill]] %s3038_s12  ;;  %p63_p3 = por %p62_p6, %p61_p4 }
  0x38   : > { %p2660_p7 = por %p2603_p2, %p61_p4  ;;  %s51_s27 = ssub.s32 %s2468_s17, %s3038_s12 }
  0x39   : > { %2179 = dma.hbm_to_vmem [thread:$0]  (!%p2628_p11), %s3018_s7, 512, %s427_s20, [#allocation8], %s2476_s26, %s2476_s26, %s2477_s29  }
  0x3a   : > { %s455_s28 = sand.u32 1, %s2460_s15   ;;  %p52_p9 = scmp.eq.s32.totalorder %s51_s27, 0 }
  0x3b   : > { %s1952_s29 = sshll.u32 %s455_s28, 3  ;;  %s1953_s20 = sshll.u32 %s2468_s17, 7 }
  0x3c   : > { %s2669_s26 = scalar_select %p52_p9, %s2460_s15, %s54_s13  }
  0x3d   : > { %s464_s4 = scalar_lea.hbm %s2978_s0, %s1953_s20  ;;  %s459_s7 = scalar_lea.vmem [#allocation4], %s1952_s29 }
  0x3e   : > { %s466_s14 = sshll.u32 %s459_s7, 4  ;;  %p2676_p11 = pnand %p2193_p12, %p63_p3  ;;  %s467_s14 = int_to_ptr.vmem [resolvable:$true] %s466_s14 }
  0x3f   : > { %s456_s12 = scalar_lea.sflag [#allocation5], %s455_s28  ;;  %s2343_s27 = scalar_lea.vmem %s467_s14, 128 }
  0x40   : > { %p2332_p2 = pneg %p2676_p11  ;;  %p2344_p13 = scmp.ne.s32.totalorder %s467_s14, %s2343_s27 }
  0x41   : > { %s2478_s13 = smov [#allocation4]  }
  0x42   : > { %p2346_p0 = pnand %p2344_p13, %p2332_p2  ;;  %s2348_s17 = sshll.u32 %s2478_s13, 4  ;;  %s2349_s17 = int_to_ptr.vmem [resolvable:$false] %s2348_s17 }
  0x43   : > { %s2350_s20 = scalar_lea.vmem %s2349_s17, 256  ;;  %p2351_p10 = scmp.lt.s32.totalorder %s467_s14, %s2349_s17 }
  0x44   : > { %p2347_p5 = pneg %p2346_p0  ;;  %p2352_p1 = scmp.lt.s32.totalorder %s2350_s20, %s2343_s27 }
  0x46   : > { %p2353_p4 = por %p2352_p1, %p2351_p10 }
  0x48   : > { %p2354_p6 = pnand %p2353_p4, %p2347_p5 }
  0x4a   : > { %2357 = shalt.err (!%p2354_p6)
}
  0x4b   : > { %2183 = dma.hbm_to_vmem [thread:$0]  (!%p2676_p11), %s464_s4, 128, %s467_s14, %s456_s12  }
  0x4c   : > { %475 = sbr.rel (%p2619_p8) target bundleno = 2456 (0x998), region = 72  ;;  %s2687_s7 = sand.u32 (!%p2619_p8), 1, %s2456_s30  }
  0x4d   : > { %s1955_s28 = sshll.u32 (!%p2619_p8), %s2687_s7, 3  ;;  %s478_s29 = scalar_lea.sflag (!%p2619_p8), [#allocation5], %s2687_s7 }
  0x4e   : > { %s481_s17 = scalar_lea.vmem (!%p2619_p8), [#allocation4], %s1955_s28  ;;  %p3022_p12 = scmp.ne.s32.totalorder (!%p2619_p8), %s3012_s23, 0 }
  0x51   : > { %2435 = dma.done.wait (%p3022_p12), %s478_s29, 128  }
  0x52   : > { %2437 = vsyncadd (%p3022_p12), %s478_s29, 4294967168  ;;  %p3023_p3 = scmp.ne.s32.totalorder %s3010_s21, 0 }
  0x54   : > { %2439 = dma.done.wait (%p3023_p3), [#allocation8], 1024  }
  0x55   : > { %2441 = vsyncadd (%p3023_p3), [#allocation8], 4294966272  ;;  %v2479_v0 = vmov 0.0   ;;  %vm2480_vm0 = vmmov 0   ;;  %v547_v1 = vld [vmem:[%s2980_s2 + $0x18] sm:$0xff]  ;;  %v546_v2 = vld [vmem:[%s2980_s2 + $0x10] sm:$0xff] }
  0x56   : > { %2045 = vmatprep.subr.mxu1 %v2479_v0  ;;  %2053 = vmatprep.mubr.msk.f32.mxu1 %vm2480_vm0, %v2479_v0  ;;  %v704_v3 = vld [vmem:[%s2979_s1 + $0x18] sm:$0xff]  ;;  %v545_v4 = vld [vmem:[%s2980_s2 + $0x8] sm:$0xff]  ;;  %v703_v5 = vld [vmem:[%s2979_s1 + $0x10] sm:$0xff]  ;;  %vm548_vm1 = vcmask 261120   ;;  %vm782_vm2 = vcmask 64512   ;;  %s2481_s13 = smov 112  }
  0x57   : > { %2067 = vmatprep.subr.mxu0 %v2479_v0  ;;  %2075 = vmatprep.mubr.msk.f32.mxu0 %vm2480_vm0, %v2479_v0  ;;  %v702_v6 = vld [vmem:[%s2979_s1 + $0x8] sm:$0xff]  ;;  %v544_v7 = vld [vmem:[%s2980_s2] sm:$0xff]  ;;  %v2731_v8 = vld [vmem:[%s481_s17] sm:$0xff]  ;;  %s2482_s20 = smov 120   ;;  %s2483_s29 = smov 104   ;;  %vm1459_vm3 = vcmask 130048  }
  0x58   : > { %2046 = vmatpush3.msra.mxu1 %v547_v1  ;;  %2068 = vmatpush3.msra.mxu0 %v704_v3  ;;  %v701_v9 = vld [vmem:[%s2979_s1] sm:$0xff]  ;;  %v626_v10 = vld [vmem:[%s2981_s3 + $0x18] sm:$0xff]  ;;  %v625_v11 = vld [vmem:[%s2981_s3 + $0x10] sm:$0xff]  ;;  %s1959_s4 = sshll.u32 %s2687_s7, 5  ;;  %s2484_s23 = smov 8   ;;  %vm1461_vm4 = vcmask 195584  }
  0x59   : > { %2047 = vmatprep.subr.mxu1 %v2479_v0  ;;  %2069 = vmatprep.subr.mxu0 %v2479_v0  ;;  %v624_v12 = vld [vmem:[%s2981_s3 + $0x8] sm:$0xff]  ;;  %v623_v13 = vld [vmem:[%s2981_s3] sm:$0xff]  ;;  %s2810_s14 = scalar_lea.vmem [#allocation11], %s1959_s4  ;;  %s2485_s17 = smov 16   ;;  %vm1670_vm5 = vcmask 523264  }
  0x5a   : > { %2048 = vmatpush3.msra.mxu1 %v546_v2  ;;  %2070 = vmatpush3.msra.mxu0 %v703_v5  ;;  %s2486_s25 = smov 24   ;;  %s1994_s21 = sshll.u32 %s2464_s16, 9 }
  0x5b   : > { %2049 = vmatprep.subr.mxu1 %v2479_v0  ;;  %2071 = vmatprep.subr.mxu0 %v2479_v0  ;;  %s1809_s12 = sshll.u32 %s2810_s14, 4  ;;  %s3024_s22 = sld [smem:[#allocation26_spill]]  ;;  %s2903_s12 = int_to_ptr.vmem [resolvable:$true] %s1809_s12 }
  0x5c   : > { %2050 = vmatpush3.msra.mxu1 %v545_v4  ;;  %2072 = vmatpush3.msra.mxu0 %v702_v6 }
  0x5d   : > { %2051 = vmatprep.subr.mxu1 %v2479_v0  ;;  %2073 = vmatprep.subr.mxu0 %v2479_v0 }
  0x5e   : > { %2052 = vmatpush3.msra.mxu1 %v544_v7  ;;  %2074 = vmatpush3.msra.mxu0 %v701_v9 }
  0x5f   : > { %2054 = vmatmul.mubr.msk.f32.vlgmr.msra.gmra.mxu1 %vm548_vm1, %v2731_v8  ;;  %2076 = vmatmul.mubr.msk.f32.vlgmr.msra.gmra.mxu0 %vm548_vm1, %v2731_v8 }
  0x60   : > { %2056 = vmatprep.subr.mxu1 %v2479_v0  ;;  %2064 = vmatprep.mubr.msk.f32.mxu1 %vm2480_vm0, %v2479_v0 }
  0x61   : > { %2088 = vmatprep.subr.mxu0 %v2479_v0  ;;  %2090 = vmatprep.mubr.msk.f32.mxu0 %vm2480_vm0, %v2479_v0  ;;  %s2901_s27 = scalar_lea.hbm %s3024_s22, %s1994_s21 }
  0x62   : > { %2057 = vmatpush3.msra.mxu1 %v626_v10 }
  0x63   : > { %2058 = vmatprep.subr.mxu1 %v2479_v0 }
  0x64   : > { %2059 = vmatpush3.msra.mxu1 %v625_v11 }
  0x65   : > { %2060 = vmatprep.subr.mxu1 %v2479_v0 }
  0x66   : > { %2061 = vmatpush3.msra.mxu1 %v624_v12 }
  0x67   : > { %2062 = vmatprep.subr.mxu1 %v2479_v0 }
  0x68   : > { %2063 = vmatpush3.msra.mxu1 %v623_v13 }
  0x69   : > { %2065 = vmatmul.mubr.msk.f32.vlgmr.msra.gmra.mxu1 %vm548_vm1, %v2731_v8  ;;  %2078 = vmatprep.subr.mxu1 %v2479_v0 }
  0x6a   : > { %2080 = vmatprep.mubr.msk.f32.mxu1 %vm2480_vm0, %v2479_v0 }
 0x11f   : > { %v618_v14 = vpop.f32.mrf.mxu1  ;;  %v775_v15 = vpop.f32.mrf.mxu0 }
 0x120   : > { %622 = vst.msk [vmem:[#allocation2] sm:$0xff] %vm548_vm1, %v618_v14  ;;  %v779_v19 = vmul.f32 0.35355338, %v775_v15 }
 0x121   : > { %v2055_v16 = vpop.f32.mrf.mxu1  ;;  %v2077_v17 = vpop.f32.mrf.mxu0 }
 0x122   : > { %v1466_v16 = vld [vmem:[#allocation7 + $0x18] sm:$0xff]  ;;  %v1465_v17 = vld [vmem:[#allocation7 + $0x10] sm:$0xff] }
 0x127   : > { %v780_v18 = vld [vmem:[#allocation2] sm:$0xff] }
 0x128   : > { %1114 = vrot.lane.b32.xlu1 %v780_v18, %s2481_s13  ;;  %946 = vrot.lane.b32.xlu0 %v780_v18, %s2482_s20 }
 0x129   : > { %2079 = vmatpush3.xpose.msk.msra.mxu1 %vm782_vm2, %v780_v18  ;;  %v693_v20 = vpop.f32.mrf.mxu1 }
 0x12a   : > { %2083 = vmatprep.subr.mxu1 %v2479_v0  ;;  %697 = vst.msk [vmem:[#allocation3] sm:$0xff] %vm548_vm1, %v693_v20 }
 0x12b   : > { %v2066_v21 = vpop.f32.mrf.mxu1 }
 0x12c   : > { %2081 = vmatmul.mubr.msk.f32.vlgmr.msra.gmra.mxu1 %vm782_vm2, %v779_v19  ;;  %1112 = vrot.lane.b32.xlu1 %v779_v19, %s2481_s13 }
 0x12d   : > { %944 = vrot.lane.b32.xlu0 %v779_v19, %s2482_s20  ;;  %2085 = vmatprep.mubr.msk.f32.mxu1 %vm2480_vm0, %v2479_v0 }
 0x130   : > { %1279 = vrot.lane.b32.xlu1 %v779_v19, %s2483_s29  ;;  %v1463_v19 = vld [vmem:[#allocation7] sm:$0xff] }
 0x131   : > { %1281 = vrot.lane.b32.xlu0 %v780_v18, %s2483_s29  ;;  %v781_v28 = vld [vmem:[#allocation3] sm:$0xff] }
 0x132   : > { %2084 = vmatpush3.msra.mxu1 %v781_v28  ;;  %v1464_v18 = vld [vmem:[#allocation7 + $0x8] sm:$0xff] }
 0x133   : > { %2093 = vmatprep.subr.mxu1 %v2479_v0 }
 0x19a   : > { %v947_v22 = vpop.permute.xlu0 %946  ;;  %v1115_v23 = vpop.permute.xlu1 %1114 }
 0x19b   : > { %2089 = vmatpush3.xpose.msk.msra.mxu0 %vm782_vm2, %v947_v22 }
 0x19c   : > { %2098 = vmatprep.subr.mxu0 %v2479_v0 }
 0x19e   : > { %v1113_v25 = vpop.permute.xlu1 %1112 }
 0x19f   : > { %v945_v24 = vpop.permute.xlu0 %944 }
 0x1a0   : > { %2091 = vmatmul.mubr.msk.f32.vlgmr.msra.gmra.mxu0 %vm782_vm2, %v945_v24 }
 0x1a1   : > { %2099 = vmatpush3.xpose.msk.msra.mxu0 %vm782_vm2, %v1115_v23  ;;  %2100 = vmatprep.mubr.msk.f32.mxu0 %vm2480_vm0, %v2479_v0 }
 0x1a2   : > { %2108 = vmatprep.subr.mxu0 %v2479_v0  ;;  %v1280_v27 = vpop.permute.xlu1 %1279 }
 0x1a3   : > { %v1282_v26 = vpop.permute.xlu0 %1281 }
 0x1a4   : > { %2101 = vmatmul.mubr.msk.f32.vlgmr.msra.gmra.mxu0 %vm782_vm2, %v1113_v25 }
 0x1a5   : > { %2109 = vmatpush3.xpose.msk.msra.mxu0 %vm782_vm2, %v1282_v26  ;;  %2110 = vmatprep.mubr.msk.f32.mxu0 %vm2480_vm0, %v2479_v0 }
 0x1a6   : > { %2118 = vmatprep.subr.mxu0 %v2479_v0 }
 0x1a8   : > { %2111 = vmatmul.mubr.msk.f32.vlgmr.msra.gmra.mxu0 %vm782_vm2, %v1280_v27 }
 0x1a9   : > { %2126 = vmatprep.mubr.msk.f32.mxu0 %vm2480_vm0, %v2479_v0  ;;  %2119 = vmatpush3.msra.mxu0 %v1466_v16 }
 0x1aa   : > { %2120 = vmatprep.subr.mxu0 %v2479_v0 }
 0x1ab   : > { %2121 = vmatpush3.msra.mxu0 %v1465_v17 }
 0x1ac   : > { %2122 = vmatprep.subr.mxu0 %v2479_v0 }
 0x1ad   : > { %2123 = vmatpush3.msra.mxu0 %v1464_v18 }
 0x1ae   : > { %2124 = vmatprep.subr.mxu0 %v2479_v0 }
 0x1af   : > { %2125 = vmatpush3.msra.mxu0 %v1463_v19 }
 0x1b0   : > { %2140 = vmatprep.subr.mxu0 %v2479_v0 }
 0x1ec   : > { %v855_v29 = vpop.f32.mrf.mxu1 }
 0x1ed   : > { %v859_v30 = vsel %vm782_vm2, %v855_v29, -inf }
 0x1ee   : > { %860 = vmax.xlane.f32.xlu0 %v859_v30  ;;  %v2082_v31 = vpop.f32.mrf.mxu1 }
 0x260   : > { %v1018_v32 = vpop.f32.mrf.mxu0 }
 0x261   : > { %v1022_v33 = vsel %vm782_vm2, %v1018_v32, -inf }
 0x262   : > { %1023 = vmax.xlane.f32.xlu1 %v1022_v33  ;;  %v2092_v34 = vpop.f32.mrf.mxu0 }
 0x264   : > { %v1186_v35 = vpop.f32.mrf.mxu0 }
 0x265   : > { %v1190_v36 = vsel %vm782_vm2, %v1186_v35, -inf }
 0x266   : > { %v2102_v37 = vpop.f32.mrf.mxu0  ;;  %1191 = vmax.xlane.f32.xlu0 %v1190_v36 }
 0x268   : > { %v1353_v38 = vpop.f32.mrf.mxu0 }
 0x269   : > { %v1357_v39 = vsel %vm782_vm2, %v1353_v38, -inf }
 0x26a   : > { %v2112_v40 = vpop.f32.mrf.mxu0  ;;  %1358 = vmax.xlane.f32.xlu0 %v1357_v39 }
 0x273   : > { %1036 = vrot.lane.b32.xlu1 %v781_v28, %s2482_s20  ;;  %s2358_s20 = scalar_lea.vmem %s2903_s12, 512 }
 0x274   : > { %p2359_p8 = scmp.ne.s32.totalorder %s2903_s12, %s2358_s20 }
 0x276   : > { %p2360_p9 = pnand %p2359_p8, %p2660_p7 }
 0x277   : > { %v861_v41 = vpop.xlane.xlu0 %860 }
 0x278   : > { %v862_v42 = vsub.f32 %v855_v29, %v861_v41  ;;  %v1573_v41 = vld [vmem:[#allocation9 + $0x18] sm:$0xff]  ;;  %p2361_p11 = pneg %p2360_p9 }
 0x27a   : > { %v863_v43 = vmul.f32 1.442695, %v862_v42  ;;  %v1572_v42 = vld [vmem:[#allocation9 + $0x10] sm:$0xff] }
 0x27c   : > { %2258 = vpow2.f32 %v863_v43  ;;  %v1571_v43 = vld [vmem:[#allocation9 + $0x8] sm:$0xff] }
 0x289   : > { %v2259_v44 = vpop.eup %2258 }
 0x28a   : > { %v865_v45 = vsel %vm782_vm2, %v2259_v44, 0.0 }
 0x297   : > { %866 = vadd.xlane.f32.xlu1 %v865_v45  ;;  %v1661_v45 = vld [vmem:[%s2987_s9 + $0x30] sm:$0xff] }
 0x2eb   : > { %v1024_v46 = vpop.xlane.xlu1 %1023 }
 0x2ec   : > { %v1025_v47 = vsub.f32 %v1018_v32, %v1024_v46  ;;  %v1660_v46 = vld [vmem:[%s2987_s9 + $0x28] sm:$0xff] }
 0x2ee   : > { %v1026_v48 = vmul.f32 1.442695, %v1025_v47  ;;  %v1659_v47 = vld [vmem:[%s2987_s9 + $0x20] sm:$0xff] }
 0x2ef   : > { %v1192_v49 = vpop.xlane.xlu0 %1191  ;;  %v1037_v61 = vpop.permute.xlu1 %1036 }
 0x2f0   : > { %2260 = vpow2.f32 %v1026_v48  ;;  %v1193_v50 = vsub.f32 %v1186_v35, %v1192_v49  ;;  %v1658_v48 = vld [vmem:[%s2987_s9 + $0x18] sm:$0xff] }
 0x2f2   : > { %v1194_v51 = vmul.f32 1.442695, %v1193_v50 }
 0x2f3   : > { %v1359_v52 = vpop.xlane.xlu0 %1358 }
 0x2f4   : > { %2262 = vpow2.f32 %v1194_v51  ;;  %v1360_v53 = vsub.f32 %v1353_v38, %v1359_v52 }
 0x2f6   : > { %v1361_v54 = vmul.f32 1.442695, %v1360_v53  ;;  %v1979_v53 = vld [vmem:[%s2983_s5] ss:$0 sm:$0xff] }
 0x2f8   : > { %2264 = vpow2.f32 %v1361_v54 }
 0x2fd   : > { %v2261_v55 = vpop.eup %2260 }
 0x2fe   : > { %v1028_v56 = vsel %vm782_vm2, %v2261_v55, 0.0 }
 0x2ff   : > { %1029 = vadd.xlane.f32.xlu0 %v1028_v56 }
 0x301   : > { %v2263_v57 = vpop.eup %2262 }
 0x302   : > { %v1196_v58 = vsel %vm782_vm2, %v2263_v57, 0.0 }
 0x303   : > { %1197 = vadd.xlane.f32.xlu1 %v1196_v58  ;;  %v1657_v58 = vld [vmem:[%s2987_s9 + $0x10] sm:$0xff] }
 0x305   : > { %v2265_v59 = vpop.eup %2264 }
 0x306   : > { %v1363_v60 = vsel %vm782_vm2, %v2265_v59, 0.0 }
 0x307   : > { %1364 = vadd.xlane.f32.xlu0 %v1363_v60  ;;  %v1655_v60 = vld [vmem:[%s2987_s9] sm:$0xff] }
 0x314   : > { %1370 = vrot.lane.b32.xlu1 %v781_v28, %s2483_s29  ;;  %s2487_s29 = smov [#allocation11]  }
 0x315   : > { %s2362_s4 = sshll.u32 %s2487_s29, 4  ;;  %s2363_s4 = int_to_ptr.vmem [resolvable:$false] %s2362_s4 }
 0x316   : > { %p2365_p2 = scmp.lt.s32.totalorder %s2903_s12, %s2363_s4 }
 0x31d   : > { %1203 = vrot.lane.b32.xlu0 %v781_v28, %s2481_s13  ;;  %s1781_s13 = scalar_lea.sflag [#allocation12], %s2687_s7 }
 0x320   : > { %v867_v62 = vpop.xlane.xlu1 %866 }
 0x321   : > { %2266 = vrcp.f32 %v867_v62 }
 0x32e   : > { %v2267_v63 = vpop.eup %2266 }
 0x32f   : > { %v869_v1 = vmul.f32 %v2267_v63, %v2259_v44  ;;  %v1662_v44 = vld [vmem:[%s2987_s9 + $0x38] sm:$0xff] }
 0x331   : > { %870 = vst.msk [vmem:[%s2810_s14] sm:$0xff] %vm782_vm2, %v869_v1  ;;  %2086 = vmatmul.mubr.msk.f32.vlgmr.msra.gmra.mxu1 %vm782_vm2, %v869_v1 }
 0x332   : > { %2094 = vmatpush3.msra.mxu1 %v1037_v61  ;;  %2095 = vmatprep.mubr.msk.f32.mxu1 %vm2480_vm0, %v2479_v0  ;;  %v1981_v61 = vld [vmem:[%s2986_s8] ss:$0 sm:$0xff] }
 0x333   : > { %2103 = vmatprep.subr.mxu1 %v2479_v0 }
 0x388   : > { %v1030_v2 = vpop.xlane.xlu0 %1029 }
 0x389   : > { %2268 = vrcp.f32 %v1030_v2 }
 0x38c   : > { %v1198_v3 = vpop.xlane.xlu1 %1197 }
 0x38d   : > { %2270 = vrcp.f32 %v1198_v3  ;;  %v1983_v3 = vld [vmem:[%s2988_s10] ss:$0 sm:$0xff] }
 0x390   : > { %v1365_v4 = vpop.xlane.xlu0 %1364  ;;  %v1371_v11 = vpop.permute.xlu1 %1370 }
 0x391   : > { %2272 = vrcp.f32 %v1365_v4 }
 0x394   : > { %v1204_v7 = vpop.permute.xlu0 %1203 }
 0x396   : > { %v2269_v5 = vpop.eup %2268 }
 0x397   : > { %v1032_v6 = vmul.f32 %v2269_v5, %v2261_v55  ;;  %v1980_v55 = vld [vmem:[%s2984_s6] ss:$0 sm:$0xff] }
 0x399   : > { %1968 = vst.msk [vmem:[%s2810_s14 + $0x8] sm:$0xff] %vm782_vm2, %v1032_v6  ;;  %2096 = vmatmul.mubr.msk.f32.vlgmr.msra.gmra.mxu1 %vm782_vm2, %v1032_v6 }
 0x39a   : > { %v2271_v9 = vpop.eup %2270  ;;  %2104 = vmatpush3.msra.mxu1 %v1204_v7  ;;  %2105 = vmatprep.mubr.msk.f32.mxu1 %vm2480_vm0, %v2479_v0 }
 0x39b   : > { %2113 = vmatprep.subr.mxu1 %v2479_v0  ;;  %v1200_v10 = vmul.f32 %v2271_v9, %v2263_v57 }
 0x39d   : > { %1972 = vst.msk [vmem:[%s2810_s14 + $0x10] sm:$0xff] %vm782_vm2, %v1200_v10  ;;  %2106 = vmatmul.mubr.msk.f32.vlgmr.msra.gmra.mxu1 %vm782_vm2, %v1200_v10 }
 0x39e   : > { %v2273_v12 = vpop.eup %2272  ;;  %2114 = vmatpush3.msra.mxu1 %v1371_v11  ;;  %2115 = vmatprep.mubr.msk.f32.mxu1 %vm2480_vm0, %v2479_v0 }
 0x39f   : > { %v1367_v13 = vmul.f32 %v2273_v12, %v2265_v59  ;;  %2129 = vmatprep.subr.mxu1 %v2479_v0  ;;  %v1656_v59 = vld [vmem:[%s2987_s9 + $0x8] sm:$0xff] }
 0x3a1   : > { %1976 = vst.msk [vmem:[%s2810_s14 + $0x18] sm:$0xff] %vm782_vm2, %v1367_v13  ;;  %2116 = vmatmul.mubr.msk.f32.vlgmr.msra.gmra.mxu1 %vm782_vm2, %v1367_v13  ;;  %s2364_s14 = scalar_lea.vmem %s2363_s4, 1024 }
 0x3a2   : > { %2137 = vmatprep.mubr.msk.f32.mxu1 %vm2480_vm0, %v2479_v0  ;;  %2130 = vmatpush3.msra.mxu1 %v1573_v41  ;;  %p2366_p13 = scmp.lt.s32.totalorder %s2364_s14, %s2358_s20 }
 0x3a3   : > { %2131 = vmatprep.subr.mxu1 %v2479_v0 }
 0x3a4   : > { %2132 = vmatpush3.msra.mxu1 %v1572_v42  ;;  %p2367_p0 = por %p2366_p13, %p2365_p2 }
 0x3a5   : > { %2133 = vmatprep.subr.mxu1 %v2479_v0 }
 0x3a6   : > { %2134 = vmatpush3.msra.mxu1 %v1571_v43  ;;  %p2368_p5 = pnand %p2367_p0, %p2361_p11 }
 0x3a7   : > { %2135 = vmatprep.subr.mxu1 %v2479_v0 }
 0x3f1   : > { %v940_v14 = vpop.f32.mrf.mxu1 }
 0x3f3   : > { %v2087_v15 = vpop.f32.mrf.mxu1 }
 0x459   : > { %v1108_v20 = vpop.f32.mrf.mxu1 }
 0x45a   : > { %1447 = vrot.lane.b32.xlu1 %v1108_v20, %s2484_s23 }
 0x45b   : > { %v2097_v21 = vpop.f32.mrf.mxu1 }
 0x45d   : > { %v1275_v22 = vpop.f32.mrf.mxu1 }
 0x45e   : > { %1451 = vrot.lane.b32.xlu0 %v1275_v22, %s2485_s17 }
 0x45f   : > { %v2107_v23 = vpop.f32.mrf.mxu1 }
 0x461   : > { %v1442_v24 = vpop.f32.mrf.mxu1 }
 0x462   : > { %1455 = vrot.lane.b32.xlu1 %v1442_v24, %s2486_s25 }
 0x463   : > { %v2117_v25 = vpop.f32.mrf.mxu1 }
 0x4cc   : > { %v1448_v26 = vpop.permute.xlu1 %1447 }
 0x4cd   : > { %v1458_v28 = vsel %vm782_vm2, %v940_v14, %v1448_v26 }
 0x4d0   : > { %v1452_v27 = vpop.permute.xlu0 %1451 }
 0x4d1   : > { %v1460_v29 = vsel %vm1459_vm3, %v1458_v28, %v1452_v27 }
 0x4d4   : > { %v1456_v30 = vpop.permute.xlu1 %1455 }
 0x4d5   : > { %v1462_v31 = vsel %vm1461_vm4, %v1460_v29, %v1456_v30 }
 0x4d6   : > { %2127 = vmatmul.mubr.msk.f32.vlgmr.msra.gmra.mxu0 %vm548_vm1, %v1462_v31 }
 0x4d7   : > { %2156 = vmatprep.mubr.msk.f32.mxu0 %vm2480_vm0, %v2479_v0  ;;  %2141 = vmatpush3.msra.mxu0 %v1662_v44 }
 0x4d8   : > { %2142 = vmatprep.subr.mxu0 %v2479_v0 }
 0x4d9   : > { %2143 = vmatpush3.msra.mxu0 %v1661_v45 }
 0x4da   : > { %2144 = vmatprep.subr.mxu0 %v2479_v0 }
 0x4db   : > { %2145 = vmatpush3.msra.mxu0 %v1660_v46 }
 0x4dc   : > { %2146 = vmatprep.subr.mxu0 %v2479_v0 }
 0x4dd   : > { %2147 = vmatpush3.msra.mxu0 %v1659_v47 }
 0x4de   : > { %2148 = vmatprep.subr.mxu0 %v2479_v0 }
 0x4df   : > { %2149 = vmatpush3.msra.mxu0 %v1658_v48 }
 0x4e0   : > { %2150 = vmatprep.subr.mxu0 %v2479_v0 }
 0x4e1   : > { %2151 = vmatpush3.msra.mxu0 %v1657_v58 }
 0x4e2   : > { %2152 = vmatprep.subr.mxu0 %v2479_v0 }
 0x4e3   : > { %2153 = vmatpush3.msra.mxu0 %v1656_v59 }
 0x4e4   : > { %2154 = vmatprep.subr.mxu0 %v2479_v0 }
 0x4e5   : > { %2155 = vmatpush3.msra.mxu0 %v1655_v60 }
 0x596   : > { %v1536_v32 = vpop.f32.mrf.mxu0 }
 0x597   : > { %v1537_v33 = vadd.f32 %v1536_v32, %v2731_v8  ;;  %v1570_v8 = vld [vmem:[#allocation9] sm:$0xff] }
 0x598   : > { %v2128_v34 = vpop.f32.mrf.mxu0  ;;  %2136 = vmatpush3.msra.mxu1 %v1570_v8 }
 0x599   : > { %v1542_v35 = vsel %vm548_vm1, %v1537_v33, 0.0 }
 0x59a   : > { %1543 = vadd.xlane.f32.xlu0 %v1542_v35 }
 0x623   : > { %v1544_v36 = vpop.xlane.xlu0 %1543 }
 0x624   : > { %v1546_v37 = vmul.f32 0.03125, %v1544_v36 }
 0x626   : > { %v1547_v38 = vsub.f32 %v1537_v33, %v1546_v37 }
 0x628   : > { %v1548_v39 = vmul.f32 %v1547_v38, %v1547_v38 }
 0x62a   : > { %v1549_v40 = vsel %vm548_vm1, %v1548_v39, 0.0 }
 0x62b   : > { %1550 = vadd.xlane.f32.xlu1 %v1549_v40 }
 0x6b4   : > { %v1551_v49 = vpop.xlane.xlu1 %1550 }
 0x6b5   : > { %v1552_v50 = vmul.f32 0.03125, %v1551_v49 }
 0x6b7   : > { %v1553_v51 = vadd.f32 1e-06, %v1552_v50 }
 0x6b9   : > { %2274 = vrsqrt.f32 %v1553_v51 }
 0x6c6   : > { %v2275_v52 = vpop.eup %2274 }
 0x6c7   : > { %v1555_v54 = vmul.f32 %v2275_v52, %v1547_v38 }
 0x6c9   : > { %v1562_v56 = vmul.f32 %v1979_v53, %v1555_v54 }
 0x6cb   : > { %v1569_v57 = vadd.f32 %v1980_v55, %v1562_v56 }
 0x6cd   : > { %2138 = vmatmul.mubr.msk.f32.vlgmr.msra.gmra.mxu1 %vm548_vm1, %v1569_v57 }
 0x78d   : > { %v1650_v62 = vpop.f32.mrf.mxu1 }
 0x78e   : > { %v1651_v63 = vadd.f32 %v1981_v61, %v1650_v62 }
 0x78f   : > { %v2139_v1 = vpop.f32.mrf.mxu1 }
 0x790   : > { %v1654_v2 = vmax.f32 %v1651_v63, 0.0 }
 0x792   : > { %2157 = vmatmul.mubr.msk.f32.vlgmr.msra.gmra.mxu0 %vm1670_vm5, %v1654_v2 }
 0x852   : > { %v1740_v4 = vpop.f32.mrf.mxu0 }
 0x853   : > { %v1741_v0 = vadd.f32 %v1983_v3, %v1740_v4 }
 0x854   : > { %v2158_v5 = vpop.f32.mrf.mxu0 }
 0x855   : > { %v1744_v6 = vadd.f32 %v1741_v0, %v1569_v57 }
 0x857   : > { %v1747_v7 = vsel %vm548_vm1, %v1744_v6, 0.0 }
 0x858   : > { %1748 = vadd.xlane.f32.xlu0 %v1747_v7 }
 0x8e1   : > { %v1749_v9 = vpop.xlane.xlu0 %1748 }
 0x8e2   : > { %v1750_v10 = vmul.f32 0.03125, %v1749_v9 }
 0x8e4   : > { %v1751_v11 = vsub.f32 %v1744_v6, %v1750_v10 }
 0x8e6   : > { %v1752_v12 = vmul.f32 %v1751_v11, %v1751_v11 }
 0x8e8   : > { %v1753_v13 = vsel %vm548_vm1, %v1752_v12, 0.0 }
 0x8e9   : > { %1754 = vadd.xlane.f32.xlu0 %v1753_v13 }
 0x8ea   : > { %2371 = shalt.err (!%p2368_p5)
}
 0x8eb   : > { %s2372_s17 = scalar_lea.hbm %s2901_s27, 512  ;;  %s2376_s19 = scalar_lea.hbm %s3024_s22, 1024 }
 0x8ec   : > { %p2373_p10 = scmp.ne.s32.totalorder %s2901_s27, %s2372_s17  ;;  %p2377_p6 = scmp.lt.s32.totalorder %s2901_s27, %s3024_s22 }
 0x8ed   : > { %p2378_p12 = scmp.lt.s32.totalorder %s2376_s19, %s2372_s17 }
 0x8ee   : > { %p2374_p1 = pnand %p2373_p10, %p2660_p7 }
 0x8ef   : > { %p2379_p3 = por %p2378_p12, %p2377_p6 }
 0x8f0   : > { %p2375_p4 = pneg %p2374_p1 }
 0x8f2   : > { %p2380_p8 = pnand %p2379_p3, %p2375_p4 }
 0x8f4   : > { %2383 = shalt.err (!%p2380_p8)
}
 0x8f5   : > { %s2488_s20 = smov 128   ;;  %s3025_s17 = sld [smem:[#allocation23_spill]] }
 0x8f6   : > { %2170 = dma.vmem_to_hbm [thread:$0]  (%p2660_p7), %s2903_s12, 512, %s2901_s27, %s1781_s13, %s2488_s20, %s2488_s20, %s2484_s23  }
 0x8f7   : > { %s3026_s19 = sld [smem:[#allocation24_spill]]  ;;  %s1989_s24 = sshll.u32 %s2464_s16, 7 }
 0x8f8   : > { %s531_s29 = scalar_lea.vmem [#allocation10], %s1955_s28  ;;  %s3027_s13 = sld [smem:[#allocation25_spill]] }
 0x8f9   : > { %s1795_s23 = sshll.u32 %s531_s29, 4  ;;  %s1776_s4 = scalar_lea.sflag [#allocation6], %s2687_s7  ;;  %s1796_s23 = int_to_ptr.vmem [resolvable:$true] %s1795_s23 }
 0x8fa   : > { %s2384_s14 = scalar_lea.vmem %s1796_s23, 128 }
 0x8fb   : > { %v1985_v18 = vld [vmem:[%s3025_s17] ss:$0 sm:$0xff]  ;;  %p2385_p9 = scmp.ne.s32.totalorder %s1796_s23, %s2384_s14  ;;  %s2489_s17 = smov [#allocation10]  }
 0x8fc   : > { %s2388_s16 = sshll.u32 %s2489_s17, 4  ;;  %s2389_s16 = int_to_ptr.vmem [resolvable:$false] %s2388_s16 }
 0x8fd   : > { %v1986_v20 = vld [vmem:[%s3026_s19] ss:$0 sm:$0xff]  ;;  %p2386_p11 = pnand %p2385_p9, %p2660_p7  ;;  %s2390_s28 = scalar_lea.vmem %s2389_s16, 256 }
 0x8fe   : > { %s1793_s20 = scalar_lea.hbm %s3027_s13, %s1989_s24  ;;  %p2391_p13 = scmp.lt.s32.totalorder %s1796_s23, %s2389_s16 }
 0x8ff   : > { %p2387_p2 = pneg %p2386_p11  ;;  %p2392_p0 = scmp.lt.s32.totalorder %s2390_s28, %s2384_s14 }
 0x901   : > { %p2393_p5 = por %p2392_p0, %p2391_p13 }
 0x903   : > { %p2394_p10 = pnand %p2393_p5, %p2387_p2 }
 0x972   : > { %v1755_v14 = vpop.xlane.xlu0 %1754 }
 0x973   : > { %v1756_v15 = vmul.f32 0.03125, %v1755_v14 }
 0x975   : > { %v1757_v16 = vadd.f32 1e-06, %v1756_v15 }
 0x977   : > { %2276 = vrsqrt.f32 %v1757_v16 }
 0x984   : > { %v2277_v17 = vpop.eup %2276 }
 0x985   : > { %v1759_v19 = vmul.f32 %v2277_v17, %v1751_v11 }
 0x987   : > { %v1766_v21 = vmul.f32 %v1985_v18, %v1759_v19 }
 0x989   : > { %v1773_v22 = vadd.f32 %v1986_v20, %v1766_v21 }
 0x98b   : > { %1774 = vst.msk [vmem:[%s531_s29] sm:$0xff] %vm548_vm1, %v1773_v22 }
 0x98c   : > { %2397 = shalt.err (!%p2394_p10)
}
 0x98d   : > { %s2398_s25 = scalar_lea.hbm %s1793_s20, 128  ;;  %s2402_s19 = scalar_lea.hbm %s3027_s13, 256 }
 0x98e   : > { %p2399_p1 = scmp.ne.s32.totalorder %s1793_s20, %s2398_s25  ;;  %p2403_p12 = scmp.lt.s32.totalorder %s1793_s20, %s3027_s13 }
 0x98f   : > { %p2404_p3 = scmp.lt.s32.totalorder %s2402_s19, %s2398_s25 }
 0x990   : > { %p2400_p4 = pnand %p2399_p1, %p2660_p7 }
 0x991   : > { %p2405_p8 = por %p2404_p3, %p2403_p12 }
 0x992   : > { %p2401_p6 = pneg %p2400_p4 }
 0x994   : > { %p2406_p9 = pnand %p2405_p8, %p2401_p6 }
 0x996   : > { %2409 = shalt.err (!%p2406_p9)
}
 0x997   : > { %2169 = dma.vmem_to_hbm [thread:$0]  (%p2660_p7), %s1796_s23, 128, %s1793_s20, %s1776_s4  }
 0x998 PF: > { %s3028_s12 = sld [smem:[#allocation17_spill]]  ;;  %p3031_p2 = scmp.ge.s32.totalorder %s2472_s18, 2 }
 0x999   : > { %s3029_s27 = sld [smem:[#allocation19_spill]] }
 0x99e   : > { %s1824_s14 = sand.u32 1, %s3028_s12  }
 0x99f   : > { %p3030_p11 = scmp.ne.s32.totalorder %s3029_s27, 0  ;;  %s1825_s17 = scalar_lea.sflag [#allocation6], %s1824_s14 }
 0x9a1   : > { %p2185_p13 = pnand %p3031_p2, %p3030_p11 }
 0x9a3   : > { %p2186_p0 = pneg %p2185_p13 }
 0x9a5   : > { %2443 = dma.done.wait (%p2186_p0), %s1825_s17, 128  }
 0x9a6   : > { %2445 = vsyncadd (%p2186_p0), %s1825_s17, 4294967168  ;;  %s1834_s16 = scalar_lea.sflag [#allocation12], %s1824_s14 }
 0x9a7   : > { %2447 = dma.done.wait (%p2186_p0), %s1834_s16, 512  }
 0x9a8   : > { %2449 = vsyncadd (%p2186_p0), %s1834_s16, 4294966784  ;;  %s35_s18 = sadd.s32 1, %s2472_s18   ;;  %s3032_s16 = sld [smem:[#allocation18_spill]] }
 0x9a9   : > { %p32_p5 = scmp.ge.s32.totalorder %s35_s18, 4   ;;  %s3033_s17 = sld [smem:[#allocation20_spill]] }
 0x9aa   : > { %s3034_s29 = smov %s2456_s30  ;;  %s3035_s30 = smov %s2460_s15 }
 0x9ab   : > { %s3036_s15 = smov %s2669_s26  ;;  %34 = sbr.rel (!%p32_p5) target bundleno = 16 (0x10), region = 150 }
 0x9b0   :  { %1839 = vsyncpa [#allocation5], 1 }
 0x9b1   :  { %1841 = vsyncpa [#allocation5 + $0x1], 1 }
 0x9b2   :  { %1842 = vsyncpa [#allocation8], 1 }
 0x9b3   :  { %1843 = vsyncpa [#allocation6], 1 }
 0x9b4   :  { %1845 = vsyncpa [#allocation6 + $0x1], 1 }
 0x9b5   :  { %1846 = vsyncpa [#allocation12], 1 }
 0x9b6   :  { %1848 = vsyncpa [#allocation12 + $0x1], 1 }

</bundles_post_ra>
